<compile_context>
chip_gen: v7x
topology: tpu7x:2x2x1
jax: 0.10.0
libtpu: 0.0.40
codegen_flags: <defaults>
</compile_context>

<pallas_src>
import jax
import jax.numpy as jnp
from jax.experimental import pallas as pl
from jax.experimental.pallas import tpu as pltpu


def _exp_kernel(x_ref, o_ref):
    # Elementwise exponential (EUP transcendental) on the whole VMEM tile.
    o_ref[...] = jnp.exp(x_ref[...])


_LANE = 128
_TARGET_BLOCK_BYTES = 4 * 1024 * 1024  # ~4 MiB per block (mem-bound streaming)


def _round_up(a, b):
    return ((a + b - 1) // b) * b


def _sublane_multiple(dtype):
    # f32 -> 8, bf16/f16 -> 16, int8/fp8 -> 32
    itemsize = jnp.dtype(dtype).itemsize
    return max(8, 32 // max(1, itemsize))


def exponential_activation(x, *, lane_width=1024):
    """Computes exp(x) elementwise via a Pallas TPU kernel.

    Accepts any shape / float dtype; preserves both (matches torch.exp).
    """
    orig_shape = x.shape
    dtype = x.dtype
    itemsize = jnp.dtype(dtype).itemsize

    x1 = x.reshape(-1)
    n = x1.shape[0]
    if n == 0:
        return jnp.exp(x)  # degenerate empty input

    # Lane-dense 2D view: (rows, L) with L a large multiple of 128.
    L = min(_round_up(lane_width, _LANE), _round_up(n, _LANE))
    n_pad = _round_up(n, L)
    if n_pad != n:
        # Only pad the small tail; sizes with numel % L == 0 skip this.
        x1 = jnp.pad(x1, (0, n_pad - n))
    R = n_pad // L
    x2 = x1.reshape(R, L)

    # Row tile sized for ~4 MiB blocks, rounded to the dtype sublane multiple.
    sub = _sublane_multiple(dtype)
    tr = max(sub, (_TARGET_BLOCK_BYTES // (L * itemsize)) // sub * sub)
    if tr >= R:
        tr = R  # block dim equal to the full array dim is always legal
    grid_rows = pl.cdiv(R, tr)  # ragged last block handled by Pallas

    out = pl.pallas_call(
        _exp_kernel,
        out_shape=jax.ShapeDtypeStruct((R, L), dtype),
        grid_spec=pltpu.PrefetchScalarGridSpec(
            num_scalar_prefetch=0,
            grid=(grid_rows,),
            in_specs=[pl.BlockSpec((tr, L), lambda i: (i, 0))],
            out_specs=pl.BlockSpec((tr, L), lambda i: (i, 0)),
        ),
        compiler_params=pltpu.CompilerParams(
            dimension_semantics=("parallel",),
            vmem_limit_bytes=32 * 1024 * 1024,
        ),
        cost_estimate=pl.CostEstimate(
            flops=0,
            transcendentals=n_pad,
            bytes_accessed=2 * n_pad * itemsize,
        ),
    )(x2)

    out_flat = out.reshape(-1)
    if n_pad != n:
        out_flat = out_flat[:n]
    return out_flat.reshape(orig_shape)


if __name__ == "__main__":
    key = jax.random.PRNGKey(0)
    # Small NCHW-like input consistent with the module's usage.
    x = jax.random.normal(key, (2, 4, 16, 16), dtype=jnp.float32)

    y = exponential_activation(x)
    jax.block_until_ready(y)

    # Correctness check against plain JAX reference (== torch.exp semantics).
    ref = jnp.exp(x)
    assert y.shape == x.shape and y.dtype == x.dtype
    assert jnp.allclose(y, ref, rtol=1e-6, atol=1e-6)

    # Ragged / non-multiple-of-128 shape.
    x2 = jax.random.normal(jax.random.PRNGKey(1), (3, 5, 7), dtype=jnp.float32)
    y2 = exponential_activation(x2)
    jax.block_until_ready(y2)
    assert jnp.allclose(y2, jnp.exp(x2), rtol=1e-6, atol=1e-6)

    # bf16 input (dtype preserved).
    x3 = jax.random.normal(jax.random.PRNGKey(2), (2, 4, 16, 16),
                           dtype=jnp.bfloat16)
    y3 = exponential_activation(x3)
    jax.block_until_ready(y3)
    assert y3.dtype == jnp.bfloat16
    assert jnp.allclose(y3.astype(jnp.float32),
                        jnp.exp(x3).astype(jnp.float32), rtol=2e-2, atol=2e-2)

    print("KERNEL_OK")
</pallas_src>

<mosaic_0001>
module attributes {stable_mosaic.version = 11 : i64} {
  func.func @_exp_kernel(%arg0: i32, %arg1: memref<2x1024xf32, #tpu.memory_space<vmem>>, %arg2: memref<2x1024xf32, #tpu.memory_space<vmem>>) attributes {dimension_semantics = [#tpu.dimension_semantics<parallel>], iteration_bounds = array<i64: 1>, scalar_prefetch = 0 : i64, scratch_operands = 0 : i64, tpu.core_type = #tpu.core_type<tc>, window_params = [{transform_indices = @transform_0, window_bounds = array<i64: 2, 1024>}, {transform_indices = @transform_1, window_bounds = array<i64: 2, 1024>}]} {
    %c0 = arith.constant 0 : index
    %c0_0 = arith.constant 0 : index
    %0 = vector.load %arg1[%c0, %c0_0] : memref<2x1024xf32, #tpu.memory_space<vmem>>, vector<2x1024xf32>
    %1 = math.exp %0 : vector<2x1024xf32>
    %c0_1 = arith.constant 0 : index
    %c0_2 = arith.constant 0 : index
    %2 = vector.load %arg2[%c0_1, %c0_2] : memref<2x1024xf32, #tpu.memory_space<vmem>>, vector<2x1024xf32>
    tpu.vector_store %arg2[%c0_1, %c0_2], %1 {strides = array<i32>} : memref<2x1024xf32, #tpu.memory_space<vmem>>, vector<2x1024xf32>,
    return
  }
  func.func @transform_0(%arg0: i32) -> (i32, i32) {
    %c0_i32 = arith.constant 0 : i32
    %c0_i32_0 = arith.constant 0 : i32
    return %arg0, %c0_i32 : i32, i32
  }
  func.func @transform_1(%arg0: i32) -> (i32, i32) {
    %c0_i32 = arith.constant 0 : i32
    %c0_i32_0 = arith.constant 0 : i32
    return %arg0, %c0_i32 : i32, i32
  }
}

</mosaic_0001>

<bundles_post_ra>
// kernel: tpu_custom_call.1
= control target key start
LH: loop header
LB: loop body
LE: loop exit
PB: predicated region body
PF: predicated region fallthrough
CT: control target
= control target key end

     0   :  { %6 = vsyncpa [#allocation3], 0  ;;  %s134_s0 = inlined_call_operand.hbm [shape: f32[2,1024], index: 0, kind: input, shape index: {}]   ;;  %s135_s1 = inlined_call_operand.hbm [shape: f32[2,1024], index: 1, kind: output, shape index: {}]  }
   0x1   :  { %7 = vsyncpa [#allocation4], 0  ;;  %s98_s6 = smov [#allocation2]   ;;  %s50_s10 = scalar_lea.hbm %s134_s0, 256 }
   0x2   :  { %s14_s7 = sshll.u32 %s98_s6, 4  ;;  %p51_p0 = scmp.ne.s32.totalorder %s134_s0, %s50_s10  ;;  %s15_s7 = int_to_ptr.vmem [resolvable:$true] %s14_s7 }
   0x3   :  { %p54_p1 = scmp.lt.u32.totalorder %s50_s10, %s134_s0 }
   0x5   :  { %p56_p2 = pnand %p54_p1, %p51_p0 }
   0x7   :  { %59 = shalt.err (!%p56_p2)
}
   0x8   :  { %s60_s15 = scalar_lea.vmem %s15_s7, 256  ;;  %p65_p4 = scmp.lt.s32.totalorder %s15_s7, %s15_s7 }
   0x9   :  { %p61_p3 = scmp.ne.s32.totalorder %s15_s7, %s60_s15  ;;  %p66_p5 = scmp.lt.s32.totalorder %s60_s15, %s60_s15 }
   0xb   :  { %p67_p6 = por %p66_p5, %p65_p4 }
   0xd   :  { %p68_p7 = pnand %p67_p6, %p61_p3 }
   0xf   :  { %71 = shalt.err (!%p68_p7)
}
  0x10   :  { %17 = dma.hbm_to_vmem [thread:$0]  %s134_s0, 256, %s15_s7, [#allocation3]  }
  0x11   :  { %94 = dma.done.wait [#allocation3], 256  }
  0x12   :  { %95 = vsyncadd [#allocation3], 4294967040  ;;  %v21_v0 = vld [vmem:[#allocation2] sm:$0xff]  ;;  %v22_v1 = vld [vmem:[#allocation2 + $0x8] sm:$0xff]  ;;  %s99_s18 = smov [#allocation5]  }
  0x13   :  { %v23_v2 = vmul.f32 1.442695, %v21_v0  ;;  %v25_v3 = vmul.f32 1.442695, %v22_v1  ;;  %s35_s19 = sshll.u32 %s99_s18, 4  ;;  %s36_s19 = int_to_ptr.vmem [resolvable:$true] %s35_s19 }
  0x14   :  { %s72_s20 = scalar_lea.vmem %s36_s19, 256  ;;  %p77_p9 = scmp.lt.s32.totalorder %s36_s19, %s36_s19 }
  0x15   :  { %46 = vpow2.f32 %v23_v2  ;;  %p73_p8 = scmp.ne.s32.totalorder %s36_s19, %s72_s20  ;;  %p78_p10 = scmp.lt.s32.totalorder %s72_s20, %s72_s20 }
  0x16   :  { %48 = vpow2.f32 %v25_v3 }
  0x17   :  { %p79_p11 = por %p78_p10, %p77_p9 }
  0x19   :  { %p80_p12 = pnand %p79_p11, %p73_p8 }
  0x1f   :  { %v47_v4 = vpop.eup %46 }
  0x20   :  { %v49_v5 = vpop.eup %48  ;;  %27 = vst [vmem:[#allocation5] sm:$0xff] %v47_v4 }
  0x21   :  { %28 = vst [vmem:[#allocation5 + $0x8] sm:$0xff] %v49_v5 }
  0x22   :  { %83 = shalt.err (!%p80_p12)
}
  0x23   :  { %s84_s22 = scalar_lea.hbm %s135_s1, 256 }
  0x24   :  { %p85_p13 = scmp.ne.s32.totalorder %s135_s1, %s84_s22  ;;  %p88_p0 = scmp.lt.u32.totalorder %s84_s22, %s135_s1 }
  0x26   :  { %p90_p1 = pnand %p88_p0, %p85_p13 }
  0x28   :  { %93 = shalt.err (!%p90_p1)
}
  0x29   :  { %38 = dma.vmem_to_hbm [thread:$0]  %s36_s19, 256, %s135_s1, [#allocation4]  }
  0x2a   :  { %96 = dma.done.wait [#allocation4], 256  }
  0x2b   :  { %97 = vsyncadd [#allocation4], 4294967040 }
  0x2c   :  { %42 = vsyncpa [#allocation3], 1 }
  0x2d   :  { %43 = vsyncpa [#allocation4], 1 }

</bundles_post_ra>
